<compile_context>
chip_gen: v7x
topology: tpu7x:2x2x1
jax: 0.10.0
libtpu: 0.0.40
codegen_flags: <defaults>
</compile_context>

<pallas_src>
import functools

import jax
import jax.numpy as jnp
from jax.experimental import pallas as pl
from jax.experimental.pallas import tpu as pltpu

MATMUL_DTYPE = jnp.bfloat16      # MXU operand dtype (accumulation stays f32)
NEG_SLOPE = 0.2                  # PyG HANConv default negative_slope
BASE_TILE = 128
NEG_BIG = -1e30


def _round_up(x, m):
    return (x + m - 1) // m * m


def _pick_tile(n_pad, target, base=BASE_TILE):
    t = max(base, min(target, n_pad))
    t = (t // base) * base
    while n_pad % t:
        t -= base
    return t


def _default_vmem_limit():
    """~100 MiB on 128-MiB-VMEM chips (v5e/v6e), 48 MiB on 64-MiB v7x."""
    try:
        info = pltpu.get_tpu_info()
        cap = getattr(info, "vmem_capacity_bytes", None)
        if cap is not None and cap >= 128 * 1024 * 1024:
            return 100 * 1024 * 1024
    except Exception:
        pass
    return 48 * 1024 * 1024


# ---------------------------------------------------------------------------
# Kernel 1: fused projection + per-role alphas
#   y     = x @ w + b                          (N, H*D)  bf16
#   alpha = y @ att_cat                        (N, K*H)  f32
# ---------------------------------------------------------------------------
def _proj_alpha_kernel(x_ref, w_ref, b_ref, att_ref, y_ref, alpha_ref):
    y = jnp.dot(x_ref[...], w_ref[...], preferred_element_type=jnp.float32) + b_ref[...]
    yb = y.astype(y_ref.dtype)
    y_ref[...] = yb
    alpha_ref[...] = jnp.dot(yb, att_ref[...], preferred_element_type=jnp.float32)


def pallas_proj_alpha(x, w, b, att_cat, *, tm=BASE_TILE):
    n, f = x.shape
    c = w.shape[1]
    kh = att_cat.shape[1]
    tm = _pick_tile(n, tm)
    assert n % tm == 0
    return pl.pallas_call(
        _proj_alpha_kernel,
        out_shape=(jax.ShapeDtypeStruct((n, c), MATMUL_DTYPE),
                   jax.ShapeDtypeStruct((n, kh), jnp.float32)),
        grid_spec=pltpu.PrefetchScalarGridSpec(
            num_scalar_prefetch=0,
            grid=(n // tm,),
            in_specs=[
                pl.BlockSpec((tm, f), lambda i: (i, 0)),
                pl.BlockSpec((f, c), lambda i: (0, 0)),
                pl.BlockSpec((1, c), lambda i: (0, 0)),
                pl.BlockSpec((c, kh), lambda i: (0, 0)),
            ],
            out_specs=[
                pl.BlockSpec((tm, c), lambda i: (i, 0)),
                pl.BlockSpec((tm, kh), lambda i: (i, 0)),
            ],
        ),
        compiler_params=pltpu.CompilerParams(dimension_semantics=("parallel",)),
    )(x.astype(MATMUL_DTYPE), w.astype(MATMUL_DTYPE),
      b.reshape(1, c).astype(jnp.float32), att_cat.astype(MATMUL_DTYPE))


# ---------------------------------------------------------------------------
# Kernel 2: per-edge-type multi-head attention (flash-style online softmax)
#   grid = (dst_tiles [parallel], src_tiles [arbitrary/reduction])
#   outputs: per-dst-tile attention output (Nd, C) and semantic-score partials
# ---------------------------------------------------------------------------
def _edge_attn_kernel(counts_ref, x_hld_ref, a_src_ref, a_dst_ref, mask_ref,
                      kw_ref, kb_ref, o_ref, sp_ref,
                      m_sc, l_sc, acc_sc, *, heads, td, n_src_tiles, n_real):
    i = pl.program_id(0)                          # dst tile (parallel)
    j = pl.program_id(1)                          # src tile (reduction)

    @pl.when(j == 0)
    def _init():
        m_sc[...] = jnp.full(m_sc.shape, NEG_BIG, m_sc.dtype)
        l_sc[...] = jnp.zeros(l_sc.shape, l_sc.dtype)
        acc_sc[...] = jnp.zeros(acc_sc.shape, acc_sc.dtype)

    # skip tiles that contain no edges (SMEM per-tile edge counts, prefetched)
    @pl.when(counts_ref[i * n_src_tiles + j] > 0)
    def _compute():
        a_d = a_dst_ref[...][:, :, None]          # (H, TD, 1)  f32
        a_s = a_src_ref[...][:, None, :]          # (H, 1, TS)  f32
        mask_b = mask_ref[...] > 0                # (TD, TS)    bool
        maskf = mask_b.astype(jnp.float32)

        logits = a_d + a_s                        # (H, TD, TS)
        logits = jnp.where(logits >= 0.0, logits, NEG_SLOPE * logits)
        # mask BEFORE the running max so a large masked logit cannot underflow
        # the valid entries (review correctness note).
        logits = jnp.where(mask_b[None], logits, NEG_BIG)

        m_cur = jnp.max(logits, axis=2)           # (H, TD)
        m_prev = m_sc[...]
        m_new = jnp.maximum(m_prev, m_cur)
        corr = jnp.exp(m_prev - m_new)            # (H, TD), in [0, 1]
        p = jnp.exp(logits - m_new[:, :, None]) * maskf[None]   # (H, TD, TS)

        m_sc[...] = m_new
        l_sc[...] = corr * l_sc[...] + jnp.sum(p, axis=2)

        # one batched MXU matmul over the head axis; head-leading accumulator
        # so the per-iteration update is pure elementwise (no slices/concats).
        xsh = x_hld_ref[...]                      # (H, TS, D) bf16
        pv = jnp.einsum("hqs,hsd->hqd", p.astype(xsh.dtype), xsh,
                        preferred_element_type=jnp.float32)     # (H, TD, D)
        acc_sc[...] = corr[:, :, None] * acc_sc[...] + pv

    @pl.when(j == pl.num_programs(1) - 1)
    def _finalize():
        inv = pl.reciprocal(jnp.maximum(l_sc[...], 1e-30), approx=True)   # (H, TD)
        outh = jnp.maximum(acc_sc[...] * inv[:, :, None], 0.0)            # (H, TD, D)
        # single relayout per dst tile -> one wide, lane-dense store
        out2 = jnp.concatenate([outh[h] for h in range(heads)], axis=-1)  # (TD, C)
        o_ref[...] = out2.astype(o_ref.dtype)
        # fused semantic-attention score partial: sum over valid rows of
        # tanh(out @ k_w + k_b)   (eliminates a full re-read of the outputs)
        k = jnp.tanh(jnp.dot(out2, kw_ref[...],
                             preferred_element_type=jnp.float32) + kb_ref[...])
        rows = jax.lax.broadcasted_iota(jnp.int32, (td, 1), 0) + i * td
        valid = (rows < n_real).astype(jnp.float32)
        sp_ref[...] = jnp.sum(k * valid, axis=0, keepdims=True)[None]     # (1,1,C)


def pallas_edge_attention(x_hld, a_src, a_dst, mask, counts, kw, kb,
                          heads, head_dim, n_real, *, td, ts, vmem_limit):
    _, ns_p, _ = x_hld.shape
    nd_p = mask.shape[0]
    c = heads * head_dim
    assert nd_p % td == 0 and ns_p % ts == 0
    ndt, nst = nd_p // td, ns_p // ts
    kern = functools.partial(_edge_attn_kernel, heads=heads, td=td,
                             n_src_tiles=nst, n_real=n_real)
    out, sp = pl.pallas_call(
        kern,
        out_shape=(jax.ShapeDtypeStruct((nd_p, c), jnp.float32),
                   jax.ShapeDtypeStruct((ndt, 1, c), jnp.float32)),
        grid_spec=pltpu.PrefetchScalarGridSpec(
            num_scalar_prefetch=1,
            grid=(ndt, nst),
            in_specs=[
                pl.BlockSpec((heads, ts, head_dim), lambda i, j, cnt: (0, j, 0)),
                pl.BlockSpec((heads, ts), lambda i, j, cnt: (0, j)),     # alpha_src
                pl.BlockSpec((heads, td), lambda i, j, cnt: (0, i)),     # alpha_dst
                pl.BlockSpec((td, ts), lambda i, j, cnt: (i, j)),        # mask int8
                pl.BlockSpec((c, c), lambda i, j, cnt: (0, 0)),          # k_w
                pl.BlockSpec((1, c), lambda i, j, cnt: (0, 0)),          # k_b
            ],
            out_specs=[
                pl.BlockSpec((td, c), lambda i, j, cnt: (i, 0)),
                pl.BlockSpec((1, 1, c), lambda i, j, cnt: (i, 0, 0)),
            ],
            scratch_shapes=[
                pltpu.VMEM((heads, td), jnp.float32),            # running max m
                pltpu.VMEM((heads, td), jnp.float32),            # running sum  l
                pltpu.VMEM((heads, td, head_dim), jnp.float32),  # head-leading acc
            ],
        ),
        compiler_params=pltpu.CompilerParams(
            dimension_semantics=("parallel", "arbitrary"),
            vmem_limit_bytes=vmem_limit,
        ),
    )(counts, x_hld.astype(MATMUL_DTYPE),
      a_src.astype(jnp.float32), a_dst.astype(jnp.float32),
      mask, kw.astype(jnp.float32), kb.reshape(1, c).astype(jnp.float32))
    return out, sp


# ---------------------------------------------------------------------------
# Kernel 3: semantic-attention blend (streamed, no (E, N, C) stack)
# ---------------------------------------------------------------------------
def _semantic_blend_kernel(beta_ref, *refs):
    o_ref = refs[-1]
    num_types = len(refs) - 1
    acc = beta_ref[0, 0] * refs[0][...]
    for e in range(1, num_types):
        acc = acc + beta_ref[0, e] * refs[e][...]
    o_ref[...] = acc


def pallas_semantic_blend(xs_list, beta, *, tn=BASE_TILE):
    n_pad, c = xs_list[0].shape
    e = len(xs_list)
    tn = _pick_tile(n_pad, tn)
    assert n_pad % tn == 0
    return pl.pallas_call(
        _semantic_blend_kernel,
        out_shape=jax.ShapeDtypeStruct((n_pad, c), jnp.float32),
        grid_spec=pltpu.PrefetchScalarGridSpec(
            num_scalar_prefetch=0,
            grid=(n_pad // tn,),
            in_specs=[pl.BlockSpec((1, e), lambda t: (0, 0),
                                   memory_space=pltpu.MemorySpace.SMEM)]
                     + [pl.BlockSpec((tn, c), lambda t: (t, 0)) for _ in range(e)],
            out_specs=pl.BlockSpec((tn, c), lambda t: (t, 0)),
        ),
        compiler_params=pltpu.CompilerParams(dimension_semantics=("parallel",)),
    )(beta.reshape(1, e).astype(jnp.float32), *xs_list)


# ---------------------------------------------------------------------------
# HAN forward (glue in plain JAX, compute in the Pallas kernels above)
# ---------------------------------------------------------------------------
def _block_diag_att(att, heads, head_dim):
    """(H, D) per-head attention vector -> (H*D, H) block-diag matrix so that
    x @ A == (x.reshape(N, H, D) * att).sum(-1)  (one wide MXU pass)."""
    eye = jnp.eye(heads, dtype=att.dtype)
    return (att[:, :, None] * eye[:, None, :]).reshape(heads * head_dim, heads)


def han_forward(params, x_dict, edge_index_dict, num_nodes, heads, hidden,
                *, tile=BASE_TILE, src_tile=2 * BASE_TILE):
    head_dim = hidden // heads
    c = hidden
    vmem_limit = _default_vmem_limit()

    # pad node counts to the tile size so all kernels see aligned blocks
    n_pad = {nt: _round_up(max(n, tile), tile) for nt, n in num_nodes.items()}
    x_pad = {nt: jnp.pad(x, ((0, n_pad[nt] - x.shape[0]), (0, 0)))
             for nt, x in x_dict.items()}

    # roles: for each node type, the (edge_type, role) alpha columns it needs
    roles = {nt: [] for nt in x_dict}
    for et in edge_index_dict:
        src_t, _, dst_t = et
        key = "__".join(et)
        roles[src_t].append((key, "src"))
        roles[dst_t].append((key, "dst"))

    # 1. fused projection + all-role alphas (single pass over x per node type)
    x_proj, alpha_of = {}, {}
    for nt, x in x_pad.items():
        rl = roles[nt]
        if rl:
            att_cat = jnp.concatenate(
                [_block_diag_att(params["att_src" if role == "src" else "att_dst"][key],
                                 heads, head_dim) for key, role in rl], axis=1)
        else:
            att_cat = jnp.zeros((c, heads), jnp.float32)
        y, alpha = pallas_proj_alpha(x, params["proj"][nt]["w"],
                                     params["proj"][nt]["b"], att_cat, tm=tile)
        x_proj[nt] = y                                           # (N_pad, C) bf16
        for k, (key, role) in enumerate(rl):
            alpha_of[(key, role)] = alpha[:, k * heads:(k + 1) * heads].T  # (H, N_pad)

    # head-leading src features for the batched PV matmul (one relayout / node type)
    x_hld = {nt: y.reshape(n_pad[nt], heads, head_dim).transpose(1, 0, 2)
             for nt, y in x_proj.items()}

    # 2. per-edge-type attention (+ fused semantic-score partials)
    out_lists = {nt: [] for nt in x_dict}
    sp_lists = {nt: [] for nt in x_dict}
    for et, edge_index in edge_index_dict.items():
        src_t, _, dst_t = et
        key = "__".join(et)
        nd_p, ns_p = n_pad[dst_t], n_pad[src_t]
        td = _pick_tile(nd_p, tile)        # keep >=2 dst tiles for v7x megacore
        ts = _pick_tile(ns_p, src_tile)    # wide K tile amortizes MXU pushes
        # dense int8 adjacency (note: duplicate edges collapse into a single
        # softmax term, unlike PyG's scatter softmax; inputs here are distinct)
        mask = jnp.zeros((nd_p, ns_p), jnp.int8)
        mask = mask.at[edge_index[1], edge_index[0]].set(1)
        ndt, nst = nd_p // td, ns_p // ts
        counts = jnp.zeros((ndt, nst), jnp.int32)
        counts = counts.at[edge_index[1] // td, edge_index[0] // ts].add(1)
        out, sp = pallas_edge_attention(
            x_hld[src_t], alpha_of[(key, "src")], alpha_of[(key, "dst")],
            mask, counts.reshape(-1), params["k_w"], params["k_b"],
            heads, head_dim, num_nodes[dst_t], td=td, ts=ts,
            vmem_limit=vmem_limit)
        out_lists[dst_t].append(out)
        sp_lists[dst_t].append(sp)

    # 3. semantic attention per destination node type (scores already computed)
    out_dict = {}
    for nt, outs in out_lists.items():
        if not outs:
            out_dict[nt] = None
            continue
        n_real = num_nodes[nt]
        kacc = jnp.stack([sp.reshape(-1, c).sum(axis=0) for sp in sp_lists[nt]],
                         axis=0)                                  # (E, C)
        score = (kacc / n_real) @ params["q"][0]                  # (E,)
        beta = jax.nn.softmax(score)
        out = pallas_semantic_blend(outs, beta, tn=tile)          # (Nd_pad, C)
        out_dict[nt] = out[:n_real]
    return out_dict


# ---------------------------------------------------------------------------
# Pure-JAX reference (mirrors the kernel's bf16 MXU casts) for validation
# ---------------------------------------------------------------------------
def han_reference(params, x_dict, edge_index_dict, num_nodes, heads, hidden):
    head_dim = hidden // heads
    x_proj = {}
    for nt, x in x_dict.items():
        w = params["proj"][nt]["w"].astype(MATMUL_DTYPE)
        y = jnp.dot(x.astype(MATMUL_DTYPE), w, preferred_element_type=jnp.float32)
        x_proj[nt] = (y + params["proj"][nt]["b"]).astype(MATMUL_DTYPE)

    out_lists = {nt: [] for nt in x_dict}
    for et, edge_index in edge_index_dict.items():
        src_t, _, dst_t = et
        key = "__".join(et)
        ns, nd = num_nodes[src_t], num_nodes[dst_t]
        a_s = jnp.dot(x_proj[src_t],
                      _block_diag_att(params["att_src"][key], heads,
                                      head_dim).astype(MATMUL_DTYPE),
                      preferred_element_type=jnp.float32)            # (Ns, H)
        a_d = jnp.dot(x_proj[dst_t],
                      _block_diag_att(params["att_dst"][key], heads,
                                      head_dim).astype(MATMUL_DTYPE),
                      preferred_element_type=jnp.float32)            # (Nd, H)
        mask = jnp.zeros((nd, ns), jnp.float32)
        mask = mask.at[edge_index[1], edge_index[0]].set(1.0)
        logits = a_d[:, None, :] + a_s[None, :, :]                   # (Nd, Ns, H)
        logits = jnp.where(logits >= 0.0, logits, NEG_SLOPE * logits)
        m3 = mask[:, :, None] > 0
        masked = jnp.where(m3, logits, NEG_BIG)
        m = jnp.max(masked, axis=1, keepdims=True)
        p = jnp.where(m3, jnp.exp(masked - m), 0.0)
        denom = jnp.maximum(jnp.sum(p, axis=1, keepdims=True), 1e-30)
        attn = p / denom
        xs_h = x_proj[src_t].astype(jnp.float32).reshape(ns, heads, head_dim)
        out = jnp.einsum("nsh,shd->nhd", attn, xs_h)
        out_lists[dst_t].append(
            jnp.maximum(out, 0.0).reshape(nd, heads * head_dim))

    out_dict = {}
    for nt, outs in out_lists.items():
        if not outs:
            out_dict[nt] = None
            continue
        xs = jnp.stack(outs, axis=0)                                  # (E, N, C)
        k = jnp.tanh(jnp.einsum("enc,cd->end", xs, params["k_w"])
                     + params["k_b"][None])
        score = jnp.einsum("ec,c->e", jnp.mean(k, axis=1), params["q"][0])
        beta = jax.nn.softmax(score)
        out_dict[nt] = jnp.einsum("e,enc->nc", beta, xs)
    return out_dict


# ---------------------------------------------------------------------------
# Deterministic setup + run
# ---------------------------------------------------------------------------
def make_edges(num_src, num_dst, deg):
    src, dst = [], []
    for j in range(num_dst):
        for k in range(deg):
            src.append((j * 5 + k * 3) % num_src)
            dst.append(j)
    return jnp.array([src, dst], dtype=jnp.int32)


if __name__ == "__main__":
    HIDDEN = 32    # hidden_channels (downscaled from 896)
    HEADS = 8      # heads           (downscaled from 128)
    TILE = 128     # dst tile -> multi-tile (parallel) grids at these node counts
    SRC_TILE = 256 # wider K tile for the online-softmax reduction axis

    node_types = {"author": (150, 16), "paper": (200, 24)}  # name -> (num_nodes, in_ch)
    edge_types = [
        ("author", "writes", "paper"),
        ("paper", "rev_writes", "author"),
        ("paper", "cites", "paper"),
    ]

    keys = iter(jax.random.split(jax.random.PRNGKey(0), 32))

    x_dict = {nt: jax.random.normal(next(keys), (n, f), jnp.float32)
              for nt, (n, f) in node_types.items()}
    num_nodes = {nt: n for nt, (n, _) in node_types.items()}

    edge_index_dict = {
        ("author", "writes", "paper"): make_edges(150, 200, 4),
        ("paper", "rev_writes", "author"): make_edges(200, 150, 4),
        ("paper", "cites", "paper"): make_edges(200, 200, 4),
    }

    params = {
        "proj": {
            nt: {
                "w": 0.1 * jax.random.normal(next(keys), (f, HIDDEN), jnp.float32),
                "b": 0.1 * jax.random.normal(next(keys), (1, HIDDEN), jnp.float32),
            }
            for nt, (_, f) in node_types.items()
        },
        "att_src": {
            "__".join(et): 0.1 * jax.random.normal(
                next(keys), (HEADS, HIDDEN // HEADS), jnp.float32)
            for et in edge_types
        },
        "att_dst": {
            "__".join(et): 0.1 * jax.random.normal(
                next(keys), (HEADS, HIDDEN // HEADS), jnp.float32)
            for et in edge_types
        },
        "k_w": 0.1 * jax.random.normal(next(keys), (HIDDEN, HIDDEN), jnp.float32),
        "k_b": 0.1 * jax.random.normal(next(keys), (1, HIDDEN), jnp.float32),
        "q": 0.1 * jax.random.normal(next(keys), (1, HIDDEN), jnp.float32),
    }

    out_dict = han_forward(params, x_dict, edge_index_dict, num_nodes,
                           HEADS, HIDDEN, tile=TILE, src_tile=SRC_TILE)
    ref_dict = han_reference(params, x_dict, edge_index_dict, num_nodes,
                             HEADS, HIDDEN)

    for nt, out in out_dict.items():
        if out is None:
            continue
        jax.block_until_ready(out)
        assert out.shape == (num_nodes[nt], HIDDEN)
        assert bool(jnp.all(jnp.isfinite(out)))
        ref = ref_dict[nt]
        err = float(jnp.max(jnp.abs(out - ref)))
        scale = float(jnp.max(jnp.abs(ref))) + 1e-6
        assert err <= 0.03 * scale + 0.03, \
            f"{nt}: max|err|={err:.4e} (scale={scale:.3e})"

    print("KERNEL_OK")
</pallas_src>

<mosaic_0001>
module attributes {stable_mosaic.version = 11 : i64} {
  func.func @_proj_alpha_kernel(%arg0: i32, %arg1: memref<128x16xbf16, #tpu.memory_space<vmem>>, %arg2: memref<16x32xbf16, #tpu.memory_space<vmem>>, %arg3: memref<1x32xf32, #tpu.memory_space<vmem>>, %arg4: memref<32x16xbf16, #tpu.memory_space<vmem>>, %arg5: memref<128x32xbf16, #tpu.memory_space<vmem>>, %arg6: memref<128x16xf32, #tpu.memory_space<vmem>>) attributes {dimension_semantics = [#tpu.dimension_semantics<parallel>], iteration_bounds = array<i64: 2>, scalar_prefetch = 0 : i64, scratch_operands = 0 : i64, tpu.core_type = #tpu.core_type<tc>, window_params = [{transform_indices = @transform_0, window_bounds = array<i64: 128, 16>}, {pipeline_mode = #tpu.pipeline_mode<synchronous>, transform_indices = @transform_1, window_bounds = array<i64: 16, 32>}, {pipeline_mode = #tpu.pipeline_mode<synchronous>, transform_indices = @transform_2, window_bounds = array<i64: 1, 32>}, {pipeline_mode = #tpu.pipeline_mode<synchronous>, transform_indices = @transform_3, window_bounds = array<i64: 32, 16>}, {transform_indices = @transform_4, window_bounds = array<i64: 128, 32>}, {transform_indices = @transform_5, window_bounds = array<i64: 128, 16>}]} {
    %c0 = arith.constant 0 : index
    %c0_0 = arith.constant 0 : index
    %0 = vector.load %arg1[%c0, %c0_0] : memref<128x16xbf16, #tpu.memory_space<vmem>>, vector<128x16xbf16>
    %c0_1 = arith.constant 0 : index
    %c0_2 = arith.constant 0 : index
    %1 = vector.load %arg2[%c0_1, %c0_2] : memref<16x32xbf16, #tpu.memory_space<vmem>>, vector<16x32xbf16>
    %cst = arith.constant dense<0.000000e+00> : vector<128x32xf32>
    %2 = tpu.matmul %0, %1, %cst {dimension_numbers = #tpu.dot_dimension_numbers<[1], [0], [0], [1], [0, 0, 1, 1], [], []>} : vector<128x16xbf16>, vector<16x32xbf16>, vector<128x32xf32> -> vector<128x32xf32>
    %c0_3 = arith.constant 0 : index
    %c0_4 = arith.constant 0 : index
    %3 = vector.load %arg3[%c0_3, %c0_4] : memref<1x32xf32, #tpu.memory_space<vmem>>, vector<1x32xf32>
    %4 = vector.broadcast %3 : vector<1x32xf32> to vector<128x32xf32>
    %5 = arith.addf %2, %4 : vector<128x32xf32>
    %6 = arith.truncf %5 : vector<128x32xf32> to vector<128x32xbf16>
    %c0_5 = arith.constant 0 : index
    %c0_6 = arith.constant 0 : index
    %7 = vector.load %arg5[%c0_5, %c0_6] : memref<128x32xbf16, #tpu.memory_space<vmem>>, vector<128x32xbf16>
    tpu.vector_store %arg5[%c0_5, %c0_6], %6 {strides = array<i32>} : memref<128x32xbf16, #tpu.memory_space<vmem>>, vector<128x32xbf16>,
    %c0_7 = arith.constant 0 : index
    %c0_8 = arith.constant 0 : index
    %8 = vector.load %arg4[%c0_7, %c0_8] : memref<32x16xbf16, #tpu.memory_space<vmem>>, vector<32x16xbf16>
    %cst_9 = arith.constant dense<0.000000e+00> : vector<128x16xf32>
    %9 = tpu.matmul %6, %8, %cst_9 {dimension_numbers = #tpu.dot_dimension_numbers<[1], [0], [0], [1], [0, 0, 1, 1], [], []>} : vector<128x32xbf16>, vector<32x16xbf16>, vector<128x16xf32> -> vector<128x16xf32>
    %c0_10 = arith.constant 0 : index
    %c0_11 = arith.constant 0 : index
    %10 = vector.load %arg6[%c0_10, %c0_11] : memref<128x16xf32, #tpu.memory_space<vmem>>, vector<128x16xf32>
    tpu.vector_store %arg6[%c0_10, %c0_11], %9 {strides = array<i32>} : memref<128x16xf32, #tpu.memory_space<vmem>>, vector<128x16xf32>,
    return
  }
  func.func @transform_0(%arg0: i32) -> (i32, i32) {
    %c0_i32 = arith.constant 0 : i32
    %c0_i32_0 = arith.constant 0 : i32
    return %arg0, %c0_i32 : i32, i32
  }
  func.func @transform_1(%arg0: i32) -> (i32, i32) {
    %c0_i32 = arith.constant 0 : i32
    %c0_i32_0 = arith.constant 0 : i32
    %c0_i32_1 = arith.constant 0 : i32
    return %c0_i32, %c0_i32_0 : i32, i32
  }
  func.func @transform_2(%arg0: i32) -> (i32, i32) {
    %c0_i32 = arith.constant 0 : i32
    %c0_i32_0 = arith.constant 0 : i32
    %c0_i32_1 = arith.constant 0 : i32
    return %c0_i32, %c0_i32_0 : i32, i32
  }
  func.func @transform_3(%arg0: i32) -> (i32, i32) {
    %c0_i32 = arith.constant 0 : i32
    %c0_i32_0 = arith.constant 0 : i32
    %c0_i32_1 = arith.constant 0 : i32
    return %c0_i32, %c0_i32_0 : i32, i32
  }
  func.func @transform_4(%arg0: i32) -> (i32, i32) {
    %c0_i32 = arith.constant 0 : i32
    %c0_i32_0 = arith.constant 0 : i32
    return %arg0, %c0_i32 : i32, i32
  }
  func.func @transform_5(%arg0: i32) -> (i32, i32) {
    %c0_i32 = arith.constant 0 : i32
    %c0_i32_0 = arith.constant 0 : i32
    return %arg0, %c0_i32 : i32, i32
  }
}

</mosaic_0001>

<bundles_post_ra>
// kernel: tpu_custom_call.1
= control target key start
LH: loop header
LB: loop body
LE: loop exit
PB: predicated region body
PF: predicated region fallthrough
CT: control target
= control target key end

     0   :  { %s948_s18 = smov 0   ;;  %s1090_s0 = inlined_call_operand.vmem [shape: bf16[256,16], index: 0, kind: input, shape index: {}]   ;;  %s1091_s1 = inlined_call_operand.vmem [shape: bf16[16,32], index: 1, kind: input, shape index: {}]   ;;  %s1092_s2 = inlined_call_operand.vmem [shape: f32[1,32], index: 2, kind: input, shape index: {}]   ;;  %s1093_s3 = inlined_call_operand.vmem [shape: bf16[32,16], index: 3, kind: input, shape index: {}]   ;;  %s1094_s4 = inlined_call_operand.vmem [shape: bf16[256,32], index: 4, kind: output, shape index: {0}]   ;;  %s1095_s5 = inlined_call_operand.vmem [shape: f32[256,16], index: 5, kind: output, shape index: {1}]  }
   0x1 LB: > { %s761_s19 = sadd.s32 4294967295, %s916_s18   ;;  %p765_p0 = scmp.ge.s32.totalorder %s916_s18, 1  ;;  %s916_s18 = sphi %s948_s18, %s16_s18  }
   0x2   : > { %p191_p1 = scmp.lt.s32.totalorder %s916_s18, 3 }
   0x4   : > { %p192_p2 = pnand %p765_p0, %p191_p1 }
   0x5   : > { %v899_v0 = vld [vmem:[%s1091_s1] sm:$0xff] (!%p192_p2)   ;;  %s766_s22 = sshll.u32 (!%p192_p2), %s761_s19, 4  ;;  %vm314_vm0 = vcmask (!%p192_p2), 130048   ;;  %v909_v10 = vld [vmem:[%s1093_s3 + $0x8] sm:$0xff] (!%p192_p2)   ;;  %vm500_vm1 = vcmask (!%p192_p2), 257024   ;;  %vm533_vm2 = vcmask (!%p192_p2), 261120  }
   0x6   : > { %195 = sbr.rel (%p192_p2) target bundleno = 478 (0x1de), region = 36  ;;  %p225_p3 = scmp.lt.s32.totalorder (!%p192_p2), %s766_s22, 31  ;;  %853 = vmatprep.subr.bf16.mxu0 (!%p192_p2), %v899_v0  ;;  %v908_v9 = vld [vmem:[%s1093_s3] sm:$0xff] (!%p192_p2)  }
   0x7   : > { %854 = vmatpush3.bf16.msra.mxu0 (!%p192_p2), %v899_v0  ;;  %871 = vmatprep.subr.bf16.mxu1 (!%p192_p2), %v908_v9  ;;  %v984_v11 = vld [vmem:[%s1092_s2] ss:$0 sm:$0xff] (!%p192_p2) }
   0x8   : > { %872 = vmatpush3.bf16.msra.mxu1 (!%p192_p2), %v908_v9 }
   0x9   : > { %873 = vmatprep.subr.bf16.mxu1 (!%p192_p2), %v909_v10 }
   0xc   : > { %874 = vmatpush3.bf16.msra.mxu1 (!%p192_p2), %v909_v10 }
   0xd   : > { %s1097_s22 = smov (!%p225_p3, %s766_s22), 31 }
   0xe   : > { %s767_s23 = sshll.u32 %s1097_s22, 2  ;;  %s771_s11 = sshll.u32 %s1097_s22, 3 }
   0xf   : > { %s228_s26 = scalar_lea.vmem %s1090_s0, %s767_s23  ;;  %s992_s10 = scalar_lea.vmem %s1094_s4, %s767_s23 }
  0x10   : > { %v900_v1 = vld [vmem:[%s228_s26] sm:$0xff]   ;;  %v901_v2 = vld [vmem:[%s228_s26 + $0x8] sm:$0xff]   ;;  %v902_v3 = vld [vmem:[%s228_s26 + $0x10] sm:$0xff]   ;;  %s1053_s14 = scalar_lea.vmem %s1095_s5, %s771_s11 }
  0x11   : > { %855 = vmatprep.mubr.msk.bf16.mxu0 %vm314_vm0, %v900_v1  ;;  %v903_v4 = vld [vmem:[%s228_s26 + $0x18] sm:$0xff]   ;;  %v904_v5 = vld [vmem:[%s228_s26 + $0x20] sm:$0xff]   ;;  %v905_v6 = vld [vmem:[%s228_s26 + $0x28] sm:$0xff]  }
  0x12   : > { %856 = vmatmul.mubr.msk.bf16.vlgmr.msra.gmra.mrb[0].mxu0 %vm314_vm0, %v901_v2  ;;  %v906_v7 = vld [vmem:[%s228_s26 + $0x30] sm:$0xff]   ;;  %v907_v8 = vld [vmem:[%s228_s26 + $0x38] sm:$0xff]  }
  0x13   : > { %859 = vmatprep.mubr.msk.bf16.mxu0 %vm314_vm0, %v902_v3 }
  0x1a   : > { %860 = vmatmul.mubr.msk.bf16.gmra.mrb[4].mxu0 %vm314_vm0, %v903_v4 }
  0x1b   : > { %863 = vmatprep.mubr.msk.bf16.mxu0 %vm314_vm0, %v904_v5 }
  0x22   : > { %864 = vmatmul.mubr.msk.bf16.gmra.mrb[8].mxu0 %vm314_vm0, %v905_v6 }
  0x23   : > { %867 = vmatprep.mubr.msk.bf16.mxu0 %vm314_vm0, %v906_v7 }
  0x2a   : > { %868 = vmatmul.mubr.msk.bf16.gmra.mrb[12].mxu0 %vm314_vm0, %v907_v8 }
  0xe5   : > { %v857_v12 = vpop.f32.mrb[0].mxu0 }
  0xe6   : > { %v382_v13 = vadd.f32 %v857_v12, %v984_v11  ;;  %v373_v14 = vpop.f32.mrb[1].mxu0 }
  0xe7   : > { %v374_v15 = vadd.f32 %v984_v11, %v373_v14  ;;  %v858_v16 = vpop.f32.mrb[2].mxu0 }
  0xe8   : > { %v820_v17 = vpack.c.bf16 %v382_v13, %v382_v13  ;;  %v385_v18 = vadd.f32 %v858_v16, %v984_v11  ;;  %v376_v19 = vpop.f32.mrb[3].mxu0 }
  0xe9   : > { %v818_v20 = vpack.c.bf16 %v374_v15, %v374_v15  ;;  %v377_v21 = vadd.f32 %v984_v11, %v376_v19 }
  0xea   : > { %503 = vst.msk [vmem:[%s992_s10 + $0x8] sm:$0xf] %vm500_vm1, %v820_v17  ;;  %v437_v22 = vpack.c.bf16 %v385_v18, %v382_v13  ;;  %v821_v23 = vpack.c.bf16 %v385_v18, %v385_v18 }
  0xeb   : > { %501 = vst.msk [vmem:[%s992_s10] sm:$0xf] %vm500_vm1, %v818_v20  ;;  %v819_v24 = vpack.c.bf16 %v377_v21, %v377_v21  ;;  %v436_v25 = vpack.c.bf16 %v377_v21, %v374_v15 }
  0xec   : > { %504 = vst.msk [vmem:[%s992_s10 + $0xc] sm:$0xf] %vm500_vm1, %v821_v23 }
  0xed   : > { %502 = vst.msk [vmem:[%s992_s10 + $0x4] sm:$0xf] %vm500_vm1, %v819_v24  ;;  %v861_v26 = vpop.f32.mrb[4].mxu0  ;;  %875 = vmatprep.mubr.msk.bf16.mxu1 %vm533_vm2, %v436_v25 }
  0xee   : > { %v398_v27 = vadd.f32 %v861_v26, %v984_v11  ;;  %v389_v28 = vpop.f32.mrb[5].mxu0  ;;  %876 = vmatmul.mubr.msk.bf16.vlgmr.msra.gmra.mrb[0].mxu1 %vm533_vm2, %v437_v22 }
  0xef   : > { %v390_v29 = vadd.f32 %v984_v11, %v389_v28  ;;  %v862_v30 = vpop.f32.mrb[6].mxu0 }
  0xf0   : > { %v824_v31 = vpack.c.bf16 %v398_v27, %v398_v27  ;;  %v401_v32 = vadd.f32 %v862_v30, %v984_v11  ;;  %v392_v33 = vpop.f32.mrb[7].mxu0 }
  0xf1   : > { %v822_v34 = vpack.c.bf16 %v390_v29, %v390_v29  ;;  %v393_v35 = vadd.f32 %v984_v11, %v392_v33 }
  0xf2   : > { %507 = vst.msk [vmem:[%s992_s10 + $0x18] sm:$0xf] %vm500_vm1, %v824_v31  ;;  %v439_v36 = vpack.c.bf16 %v401_v32, %v398_v27  ;;  %v825_v37 = vpack.c.bf16 %v401_v32, %v401_v32 }
  0xf3   : > { %505 = vst.msk [vmem:[%s992_s10 + $0x10] sm:$0xf] %vm500_vm1, %v822_v34  ;;  %v438_v38 = vpack.c.bf16 %v393_v35, %v390_v29  ;;  %v823_v39 = vpack.c.bf16 %v393_v35, %v393_v35 }
  0xf4   : > { %508 = vst.msk [vmem:[%s992_s10 + $0x1c] sm:$0xf] %vm500_vm1, %v825_v37 }
  0xf5   : > { %506 = vst.msk [vmem:[%s992_s10 + $0x14] sm:$0xf] %vm500_vm1, %v823_v39  ;;  %v865_v40 = vpop.f32.mrb[8].mxu0  ;;  %879 = vmatprep.mubr.msk.bf16.mxu1 %vm533_vm2, %v438_v38 }
  0xf6   : > { %v414_v41 = vadd.f32 %v865_v40, %v984_v11  ;;  %v405_v42 = vpop.f32.mrb[9].mxu0  ;;  %880 = vmatmul.mubr.msk.bf16.gmra.mrb[4].mxu1 %vm533_vm2, %v439_v36 }
  0xf7   : > { %v406_v43 = vadd.f32 %v984_v11, %v405_v42  ;;  %v866_v44 = vpop.f32.mrb[10].mxu0 }
  0xf8   : > { %v828_v45 = vpack.c.bf16 %v414_v41, %v414_v41  ;;  %v417_v46 = vadd.f32 %v866_v44, %v984_v11  ;;  %v408_v47 = vpop.f32.mrb[11].mxu0 }
  0xf9   : > { %v826_v48 = vpack.c.bf16 %v406_v43, %v406_v43  ;;  %v409_v49 = vadd.f32 %v984_v11, %v408_v47 }
  0xfa   : > { %511 = vst.msk [vmem:[%s992_s10 + $0x28] sm:$0xf] %vm500_vm1, %v828_v45  ;;  %v441_v50 = vpack.c.bf16 %v417_v46, %v414_v41  ;;  %v829_v51 = vpack.c.bf16 %v417_v46, %v417_v46 }
  0xfb   : > { %509 = vst.msk [vmem:[%s992_s10 + $0x20] sm:$0xf] %vm500_vm1, %v826_v48  ;;  %v440_v52 = vpack.c.bf16 %v409_v49, %v406_v43  ;;  %v827_v53 = vpack.c.bf16 %v409_v49, %v409_v49 }
  0xfc   : > { %512 = vst.msk [vmem:[%s992_s10 + $0x2c] sm:$0xf] %vm500_vm1, %v829_v51 }
  0xfd   : > { %510 = vst.msk [vmem:[%s992_s10 + $0x24] sm:$0xf] %vm500_vm1, %v827_v53  ;;  %v869_v54 = vpop.f32.mrb[12].mxu0  ;;  %883 = vmatprep.mubr.msk.bf16.mxu1 %vm533_vm2, %v440_v52 }
  0xfe   : > { %v430_v55 = vadd.f32 %v869_v54, %v984_v11  ;;  %v421_v56 = vpop.f32.mrb[13].mxu0  ;;  %884 = vmatmul.mubr.msk.bf16.gmra.mrb[8].mxu1 %vm533_vm2, %v441_v50 }
  0xff   : > { %v422_v57 = vadd.f32 %v984_v11, %v421_v56  ;;  %v870_v58 = vpop.f32.mrb[14].mxu0 }
 0x100   : > { %v832_v59 = vpack.c.bf16 %v430_v55, %v430_v55  ;;  %v433_v60 = vadd.f32 %v870_v58, %v984_v11  ;;  %v424_v61 = vpop.f32.mrb[15].mxu0 }
 0x101   : > { %v830_v62 = vpack.c.bf16 %v422_v57, %v422_v57  ;;  %v425_v63 = vadd.f32 %v984_v11, %v424_v61 }
 0x102   : > { %515 = vst.msk [vmem:[%s992_s10 + $0x38] sm:$0xf] %vm500_vm1, %v832_v59  ;;  %v443_v0 = vpack.c.bf16 %v433_v60, %v430_v55  ;;  %v833_v1 = vpack.c.bf16 %v433_v60, %v433_v60 }
 0x103   : > { %513 = vst.msk [vmem:[%s992_s10 + $0x30] sm:$0xf] %vm500_vm1, %v830_v62  ;;  %v442_v2 = vpack.c.bf16 %v425_v63, %v422_v57  ;;  %v831_v3 = vpack.c.bf16 %v425_v63, %v425_v63 }
 0x104   : > { %516 = vst.msk [vmem:[%s992_s10 + $0x3c] sm:$0xf] %vm500_vm1, %v833_v1 }
 0x105   : > { %514 = vst.msk [vmem:[%s992_s10 + $0x34] sm:$0xf] %vm500_vm1, %v831_v3  ;;  %887 = vmatprep.mubr.msk.bf16.mxu1 %vm533_vm2, %v442_v2 }
 0x106   : > { %888 = vmatmul.mubr.msk.bf16.gmra.mrb[12].mxu1 %vm533_vm2, %v443_v0 }
 0x1c1   : > { %v877_v4 = vpop.f32.mrb[0].mxu1 }
 0x1c2   : > { %657 = vst.msk [vmem:[%s1053_s14 + $0x10] sm:$0xff] %vm314_vm0, %v877_v4  ;;  %v592_v5 = vpop.f32.mrb[1].mxu1 }
 0x1c3   : > { %655 = vst.msk [vmem:[%s1053_s14] sm:$0xff] %vm314_vm0, %v592_v5  ;;  %v878_v6 = vpop.f32.mrb[2].mxu1 }
 0x1c4   : > { %658 = vst.msk [vmem:[%s1053_s14 + $0x18] sm:$0xff] %vm314_vm0, %v878_v6  ;;  %v595_v7 = vpop.f32.mrb[3].mxu1 }
 0x1c5   : > { %656 = vst.msk [vmem:[%s1053_s14 + $0x8] sm:$0xff] %vm314_vm0, %v595_v7 }
 0x1c9   : > { %v881_v8 = vpop.f32.mrb[4].mxu1 }
 0x1ca   : > { %661 = vst.msk [vmem:[%s1053_s14 + $0x30] sm:$0xff] %vm314_vm0, %v881_v8  ;;  %v608_v9 = vpop.f32.mrb[5].mxu1 }
 0x1cb   : > { %659 = vst.msk [vmem:[%s1053_s14 + $0x20] sm:$0xff] %vm314_vm0, %v608_v9  ;;  %v882_v10 = vpop.f32.mrb[6].mxu1 }
 0x1cc   : > { %662 = vst.msk [vmem:[%s1053_s14 + $0x38] sm:$0xff] %vm314_vm0, %v882_v10  ;;  %v611_v11 = vpop.f32.mrb[7].mxu1 }
 0x1cd   : > { %660 = vst.msk [vmem:[%s1053_s14 + $0x28] sm:$0xff] %vm314_vm0, %v611_v11 }
 0x1d1   : > { %v885_v12 = vpop.f32.mrb[8].mxu1 }
 0x1d2   : > { %665 = vst.msk [vmem:[%s1053_s14 + $0x50] sm:$0xff] %vm314_vm0, %v885_v12  ;;  %v624_v13 = vpop.f32.mrb[9].mxu1 }
 0x1d3   : > { %663 = vst.msk [vmem:[%s1053_s14 + $0x40] sm:$0xff] %vm314_vm0, %v624_v13  ;;  %v886_v14 = vpop.f32.mrb[10].mxu1 }
 0x1d4   : > { %666 = vst.msk [vmem:[%s1053_s14 + $0x58] sm:$0xff] %vm314_vm0, %v886_v14  ;;  %v627_v15 = vpop.f32.mrb[11].mxu1 }
 0x1d5   : > { %664 = vst.msk [vmem:[%s1053_s14 + $0x48] sm:$0xff] %vm314_vm0, %v627_v15 }
 0x1d9   : > { %v889_v16 = vpop.f32.mrb[12].mxu1 }
 0x1da   : > { %669 = vst.msk [vmem:[%s1053_s14 + $0x70] sm:$0xff] %vm314_vm0, %v889_v16  ;;  %v640_v17 = vpop.f32.mrb[13].mxu1 }
 0x1db   : > { %667 = vst.msk [vmem:[%s1053_s14 + $0x60] sm:$0xff] %vm314_vm0, %v640_v17  ;;  %v890_v18 = vpop.f32.mrb[14].mxu1 }
 0x1dc   : > { %670 = vst.msk [vmem:[%s1053_s14 + $0x78] sm:$0xff] %vm314_vm0, %v890_v18  ;;  %v643_v19 = vpop.f32.mrb[15].mxu1 }
 0x1dd   : > { %668 = vst.msk [vmem:[%s1053_s14 + $0x68] sm:$0xff] %vm314_vm0, %v643_v19 }
 0x1de PF: > { %s16_s18 = sadd.s32 1, %s916_s18  }
 0x1df   : > { %p13_p4 = scmp.ge.s32.totalorder %s16_s18, 4  }
 0x1e1   :  { %15 = sbr.rel (!%p13_p4) target bundleno = 1 (0x1), region = 78 }

</bundles_post_ra>
